<compile_context>
chip_gen: v6e
topology: v6e:2x2x1
jax: 0.10.0
libtpu: 0.0.40
codegen_flags: <defaults>
</compile_context>

<pallas_src>
import jax
import jax.numpy as jnp
from jax.experimental import pallas as pl
from jax.experimental.pallas import tpu as pltpu


# --------------------------------------------------------------------------
# In-kernel math helpers.
# --------------------------------------------------------------------------
def _clamped_log(x):
    # PyTorch BCELoss clamps log() at -100.
    return jnp.maximum(jnp.log(x), -100.0)


def _build_label_vectors(lab_ref, b):
    """Rebuild (B,1) f32 label vectors from 2B SMEM scalars.

    lab_ref is an SMEM ref of shape (>= 2B,); entries [0:B] are the labels
    for the 'nor' half of the BCE concat, [B:2B] for the 'abn' half.
    B is static and small, so B unrolled select ops are cheaper than a
    padded (2, 8, 128) VMEM label DMA.
    """
    row = jax.lax.broadcasted_iota(jnp.int32, (b, 1), 0)
    y_nor = jnp.zeros((b, 1), jnp.float32)
    y_abn = jnp.zeros((b, 1), jnp.float32)
    for i in range(b):  # static unroll over batch
        sel = row == i
        y_nor = jnp.where(sel, lab_ref[i], y_nor)
        y_abn = jnp.where(sel, lab_ref[b + i], y_abn)
    return y_nor, y_abn


def _mil_loss_value(y_nor, y_abn, nor, abn):
    """MIL BCE loss: mean over the concatenated 2B per-video means."""
    b = nor.shape[0]
    inv = 1.0 / (2.0 * b)  # folded into the vector math before the reduce
    nor_mean = jnp.mean(nor, axis=-1, keepdims=True)  # (B, 1)
    abn_mean = jnp.mean(abn, axis=-1, keepdims=True)  # (B, 1)
    bce_nor = -(y_nor * _clamped_log(nor_mean) +
                (1.0 - y_nor) * _clamped_log(1.0 - nor_mean))
    bce_abn = -(y_abn * _clamped_log(abn_mean) +
                (1.0 - y_abn) * _clamped_log(1.0 - abn_mean))
    return jnp.sum((bce_nor + bce_abn) * inv)


def _triplet_loss_value(nor_ref, abn_ref):
    """Triplet margin loss (margin=15, p=2), zero anchor, 1-D features."""
    inv = 1.0 / nor_ref.size
    d_ap = jnp.abs(1e-6 - nor_ref)
    d_an = jnp.abs(1e-6 - abn_ref)
    per = jnp.maximum(d_ap - d_an + 15.0, 0.0)
    return jnp.sum(per * inv)


# --------------------------------------------------------------------------
# Kernel bodies (grid-less, single block).
# --------------------------------------------------------------------------
def _fused_kernel(lab_ref, nor_s_ref, abn_s_ref, nor_r_ref, abn_r_ref, out_ref):
    # lab_ref               : (2B,)   f32  SMEM
    # nor_s_ref / abn_s_ref : (B, T)  any  VMEM (cast to f32 in-kernel)
    # nor_r_ref / abn_r_ref : lane-dense 2D any VMEM
    # out_ref               : (3,)    f32  SMEM -> [total, mil, triplet]
    b = nor_s_ref.shape[0]
    y_nor, y_abn = _build_label_vectors(lab_ref, b)
    mil = _mil_loss_value(y_nor, y_abn,
                          nor_s_ref[...].astype(jnp.float32),
                          abn_s_ref[...].astype(jnp.float32))
    trip = _triplet_loss_value(nor_r_ref[...].astype(jnp.float32),
                               abn_r_ref[...].astype(jnp.float32))
    out_ref[0] = mil + trip
    out_ref[1] = mil
    out_ref[2] = trip


def _mil_kernel(lab_ref, nor_s_ref, abn_s_ref, out_ref):
    b = nor_s_ref.shape[0]
    y_nor, y_abn = _build_label_vectors(lab_ref, b)
    out_ref[0] = _mil_loss_value(y_nor, y_abn,
                                 nor_s_ref[...].astype(jnp.float32),
                                 abn_s_ref[...].astype(jnp.float32))


def _triplet_kernel(nor_r_ref, abn_r_ref, out_ref):
    out_ref[0] = _triplet_loss_value(nor_r_ref[...].astype(jnp.float32),
                                     abn_r_ref[...].astype(jnp.float32))


_VMEM = pl.BlockSpec(memory_space=pltpu.MemorySpace.VMEM)
_SMEM = pl.BlockSpec(memory_space=pltpu.MemorySpace.SMEM)


def _cost_estimate(arrays, transcendentals):
    # Advisory "this is tiny" hint for XLA's scheduler.
    bytes_accessed = sum(int(a.size) * a.dtype.itemsize for a in arrays) + 16
    flops = sum(12 * int(a.size) for a in arrays)
    return pl.CostEstimate(flops=flops,
                           transcendentals=int(transcendentals),
                           bytes_accessed=bytes_accessed)


def _lane_dense(x):
    """Free row-major reshape so the order-free triplet slab fills lanes."""
    n = int(x.size)
    if n % 128 == 0:
        return x.reshape(n // 128, 128)
    return x.reshape(1, n)


# --------------------------------------------------------------------------
# Public forward: mirrors RTFM_Loss.forward(result, label, step).
# --------------------------------------------------------------------------
def rtfm_loss(result, label, step=0):
    del step  # unused, kept for signature parity
    losses = {}
    has_mil = 'mil' in result
    has_trip = 'triplet' in result
    if not (has_mil or has_trip):
        return jnp.float32(0.0), losses

    if has_mil:
        nor_score = result['mil']['nor_score']  # (B, T), native dtype
        abn_score = result['mil']['abn_score']  # (B, T)
        b = nor_score.shape[0]
        # Flat f32 labels go to SMEM; kernel reads the first 2B scalars.
        labels = jnp.asarray(label, jnp.float32).reshape(-1)
    if has_trip:
        nor_ref = _lane_dense(result['triplet']['nor_ref'])
        abn_ref = _lane_dense(result['triplet']['abn_ref'])

    if has_mil and has_trip:
        out = pl.pallas_call(
            _fused_kernel,
            out_shape=jax.ShapeDtypeStruct((3,), jnp.float32),
            in_specs=[_SMEM, _VMEM, _VMEM, _VMEM, _VMEM],
            out_specs=_SMEM,
            cost_estimate=_cost_estimate(
                (nor_score, abn_score, nor_ref, abn_ref),
                transcendentals=4 * b),
        )(labels, nor_score, abn_score, nor_ref, abn_ref)
        loss = out[0]
        losses['mil_loss'] = out[1]
        losses['triplet_loss'] = out[2]
    elif has_mil:
        out = pl.pallas_call(
            _mil_kernel,
            out_shape=jax.ShapeDtypeStruct((1,), jnp.float32),
            in_specs=[_SMEM, _VMEM, _VMEM],
            out_specs=_SMEM,
            cost_estimate=_cost_estimate((nor_score, abn_score),
                                         transcendentals=4 * b),
        )(labels, nor_score, abn_score)
        loss = out[0]
        losses['mil_loss'] = out[0]
    else:
        out = pl.pallas_call(
            _triplet_kernel,
            out_shape=jax.ShapeDtypeStruct((1,), jnp.float32),
            in_specs=[_VMEM, _VMEM],
            out_specs=_SMEM,
            cost_estimate=_cost_estimate((nor_ref, abn_ref),
                                         transcendentals=0),
        )(nor_ref, abn_ref)
        loss = out[0]
        losses['triplet_loss'] = out[0]

    return loss, losses


# --------------------------------------------------------------------------
# Pure-JAX reference for correctness checks.
# --------------------------------------------------------------------------
def _reference(result, label):
    loss = jnp.float32(0.0)
    losses = {}
    if 'mil' in result:
        nor = result['mil']['nor_score'].astype(jnp.float32).mean(-1)
        abn = result['mil']['abn_score'].astype(jnp.float32).mean(-1)
        scores = jnp.concatenate([nor, abn], axis=0)
        y = jnp.asarray(label, jnp.float32)
        bce = -jnp.mean(y * jnp.maximum(jnp.log(scores), -100.0) +
                        (1.0 - y) * jnp.maximum(jnp.log(1.0 - scores), -100.0))
        loss = loss + bce
        losses['mil_loss'] = bce
    if 'triplet' in result:
        nr = result['triplet']['nor_ref'].astype(jnp.float32)
        ar = result['triplet']['abn_ref'].astype(jnp.float32)
        trip = jnp.mean(jnp.maximum(
            jnp.abs(1e-6 - nr) - jnp.abs(1e-6 - ar) + 15.0, 0.0))
        loss = loss + trip
        losses['triplet_loss'] = trip
    return loss, losses


if __name__ == "__main__":
    key = jax.random.PRNGKey(0)
    B, T = 2, 16
    k1, k2, k3, k4 = jax.random.split(key, 4)

    # Scores must be valid probabilities for BCE.
    nor_score = jax.nn.sigmoid(jax.random.normal(k1, (B, T), jnp.float32))
    abn_score = jax.nn.sigmoid(jax.random.normal(k2, (B, T), jnp.float32))
    nor_ref = jax.random.uniform(k3, (B, T), jnp.float32)
    abn_ref = jax.random.uniform(k4, (B, T), jnp.float32) + 1.0

    # label: first B entries for the normal half (0), next B abnormal (1).
    label = jnp.concatenate([jnp.zeros((B,), jnp.float32),
                             jnp.ones((B,), jnp.float32)], axis=0)

    result = {
        'mil': {'nor_score': nor_score, 'abn_score': abn_score},
        'triplet': {'nor_ref': nor_ref, 'abn_ref': abn_ref},
    }

    # Fused path (both losses in one pallas_call).
    loss, losses = rtfm_loss(result, label, step=0)
    jax.block_until_ready(loss)
    ref_loss, ref_losses = _reference(result, label)
    assert jnp.allclose(losses['mil_loss'], ref_losses['mil_loss'],
                        rtol=1e-5, atol=1e-5)
    assert jnp.allclose(losses['triplet_loss'], ref_losses['triplet_loss'],
                        rtol=1e-5, atol=1e-5)
    assert jnp.allclose(loss, ref_loss, rtol=1e-5, atol=1e-5)

    # Single-branch paths.
    mil_loss, mil_losses = rtfm_loss({'mil': result['mil']}, label)
    jax.block_until_ready(mil_loss)
    assert jnp.allclose(mil_losses['mil_loss'], ref_losses['mil_loss'],
                        rtol=1e-5, atol=1e-5)

    trip_loss, trip_losses = rtfm_loss({'triplet': result['triplet']}, label)
    jax.block_until_ready(trip_loss)
    assert jnp.allclose(trip_losses['triplet_loss'], ref_losses['triplet_loss'],
                        rtol=1e-5, atol=1e-5)

    # bf16 inputs exercise the minimum-byte DMA + in-kernel upcast path.
    result_bf16 = {
        'mil': {'nor_score': nor_score.astype(jnp.bfloat16),
                'abn_score': abn_score.astype(jnp.bfloat16)},
        'triplet': {'nor_ref': nor_ref.astype(jnp.bfloat16),
                    'abn_ref': abn_ref.astype(jnp.bfloat16)},
    }
    bf_loss, _ = rtfm_loss(result_bf16, label)
    jax.block_until_ready(bf_loss)
    assert jnp.allclose(bf_loss, ref_loss, rtol=5e-2, atol=5e-2)

    print("KERNEL_OK")
</pallas_src>

<mosaic_0001>
module attributes {stable_mosaic.version = 11 : i64} {
  func.func @_fused_kernel(%arg0: memref<4xf32, #tpu.memory_space<smem>>, %arg1: memref<2x16xf32, #tpu.memory_space<vmem>>, %arg2: memref<2x16xf32, #tpu.memory_space<vmem>>, %arg3: memref<1x32xf32, #tpu.memory_space<vmem>>, %arg4: memref<1x32xf32, #tpu.memory_space<vmem>>, %arg5: memref<3xf32, #tpu.memory_space<smem>>) attributes {dimension_semantics = [], scalar_prefetch = 0 : i64, scratch_operands = 0 : i64, tpu.core_type = #tpu.core_type<tc>} {
    %0 = tpu.iota {dimensions = array<i32: 0>} : vector<2x1xi32>
    %cst = arith.constant 0.000000e+00 : f32
    %1 = vector.broadcast %cst : f32 to vector<2x1xf32>
    %cst_0 = arith.constant 0.000000e+00 : f32
    %2 = vector.broadcast %cst_0 : f32 to vector<2x1xf32>
    %c0_i32 = arith.constant 0 : i32
    %3 = vector.broadcast %c0_i32 : i32 to vector<2x1xi32>
    %4 = arith.cmpi eq, %0, %3 : vector<2x1xi32>
    %c0 = arith.constant 0 : index
    %5 = memref.load %arg0[%c0] : memref<4xf32, #tpu.memory_space<smem>>
    %6 = vector.broadcast %5 : f32 to vector<2x1xf32>
    %7 = arith.select %4, %6, %1 : vector<2x1xi1>, vector<2x1xf32>
    %c2 = arith.constant 2 : index
    %8 = memref.load %arg0[%c2] : memref<4xf32, #tpu.memory_space<smem>>
    %9 = vector.broadcast %8 : f32 to vector<2x1xf32>
    %10 = arith.select %4, %9, %2 : vector<2x1xi1>, vector<2x1xf32>
    %c1_i32 = arith.constant 1 : i32
    %11 = vector.broadcast %c1_i32 : i32 to vector<2x1xi32>
    %12 = arith.cmpi eq, %0, %11 : vector<2x1xi32>
    %c1 = arith.constant 1 : index
    %13 = memref.load %arg0[%c1] : memref<4xf32, #tpu.memory_space<smem>>
    %14 = vector.broadcast %13 : f32 to vector<2x1xf32>
    %15 = arith.select %12, %14, %7 : vector<2x1xi1>, vector<2x1xf32>
    %c3 = arith.constant 3 : index
    %16 = memref.load %arg0[%c3] : memref<4xf32, #tpu.memory_space<smem>>
    %17 = vector.broadcast %16 : f32 to vector<2x1xf32>
    %18 = arith.select %12, %17, %10 : vector<2x1xi1>, vector<2x1xf32>
    %c0_1 = arith.constant 0 : index
    %c0_2 = arith.constant 0 : index
    %19 = vector.load %arg1[%c0_1, %c0_2] : memref<2x16xf32, #tpu.memory_space<vmem>>, vector<2x16xf32>
    %c0_3 = arith.constant 0 : index
    %c0_4 = arith.constant 0 : index
    %20 = vector.load %arg2[%c0_3, %c0_4] : memref<2x16xf32, #tpu.memory_space<vmem>>, vector<2x16xf32>
    %cst_5 = arith.constant dense<0.000000e+00> : vector<2xf32>
    %21 = vector.multi_reduction <add>, %19, %cst_5 [1] : vector<2x16xf32> to vector<2xf32>
    %22 = vector.shape_cast %21 : vector<2xf32> to vector<2x1xf32>
    %cst_6 = arith.constant 1.600000e+01 : f32
    %23 = vector.broadcast %cst_6 : f32 to vector<2x1xf32>
    %24 = arith.divf %22, %23 : vector<2x1xf32>
    %cst_7 = arith.constant dense<0.000000e+00> : vector<2xf32>
    %25 = vector.multi_reduction <add>, %20, %cst_7 [1] : vector<2x16xf32> to vector<2xf32>
    %26 = vector.shape_cast %25 : vector<2xf32> to vector<2x1xf32>
    %cst_8 = arith.constant 1.600000e+01 : f32
    %27 = vector.broadcast %cst_8 : f32 to vector<2x1xf32>
    %28 = arith.divf %26, %27 : vector<2x1xf32>
    %29 = math.log %24 : vector<2x1xf32>
    %cst_9 = arith.constant -1.000000e+02 : f32
    %30 = vector.broadcast %cst_9 : f32 to vector<2x1xf32>
    %31 = arith.maximumf %29, %30 : vector<2x1xf32>
    %32 = arith.mulf %15, %31 : vector<2x1xf32>
    %cst_10 = arith.constant 1.000000e+00 : f32
    %33 = vector.broadcast %cst_10 : f32 to vector<2x1xf32>
    %34 = arith.subf %33, %15 : vector<2x1xf32>
    %cst_11 = arith.constant 1.000000e+00 : f32
    %35 = vector.broadcast %cst_11 : f32 to vector<2x1xf32>
    %36 = arith.subf %35, %24 : vector<2x1xf32>
    %37 = math.log %36 : vector<2x1xf32>
    %cst_12 = arith.constant -1.000000e+02 : f32
    %38 = vector.broadcast %cst_12 : f32 to vector<2x1xf32>
    %39 = arith.maximumf %37, %38 : vector<2x1xf32>
    %40 = arith.mulf %34, %39 : vector<2x1xf32>
    %41 = arith.addf %32, %40 : vector<2x1xf32>
    %cst_13 = arith.constant 0.000000e+00 : f32
    %42 = vector.broadcast %cst_13 : f32 to vector<2x1xf32>
    %43 = arith.subf %42, %41 : vector<2x1xf32>
    %44 = math.log %28 : vector<2x1xf32>
    %cst_14 = arith.constant -1.000000e+02 : f32
    %45 = vector.broadcast %cst_14 : f32 to vector<2x1xf32>
    %46 = arith.maximumf %44, %45 : vector<2x1xf32>
    %47 = arith.mulf %18, %46 : vector<2x1xf32>
    %cst_15 = arith.constant 1.000000e+00 : f32
    %48 = vector.broadcast %cst_15 : f32 to vector<2x1xf32>
    %49 = arith.subf %48, %18 : vector<2x1xf32>
    %cst_16 = arith.constant 1.000000e+00 : f32
    %50 = vector.broadcast %cst_16 : f32 to vector<2x1xf32>
    %51 = arith.subf %50, %28 : vector<2x1xf32>
    %52 = math.log %51 : vector<2x1xf32>
    %cst_17 = arith.constant -1.000000e+02 : f32
    %53 = vector.broadcast %cst_17 : f32 to vector<2x1xf32>
    %54 = arith.maximumf %52, %53 : vector<2x1xf32>
    %55 = arith.mulf %49, %54 : vector<2x1xf32>
    %56 = arith.addf %47, %55 : vector<2x1xf32>
    %cst_18 = arith.constant 0.000000e+00 : f32
    %57 = vector.broadcast %cst_18 : f32 to vector<2x1xf32>
    %58 = arith.subf %57, %56 : vector<2x1xf32>
    %59 = arith.addf %43, %58 : vector<2x1xf32>
    %cst_19 = arith.constant 2.500000e-01 : f32
    %60 = vector.broadcast %cst_19 : f32 to vector<2x1xf32>
    %61 = arith.mulf %59, %60 : vector<2x1xf32>
    %62 = vector.shape_cast %61 : vector<2x1xf32> to vector<1x2x1xf32>
    %cst_20 = arith.constant dense<0.000000e+00> : vector<1xf32>
    %63 = vector.multi_reduction <add>, %62, %cst_20 [1, 2] : vector<1x2x1xf32> to vector<1xf32>
    %64 = vector.shape_cast %63 : vector<1xf32> to vector<1x1x1xf32>
    %65 = vector.extract %64[0, 0, 0] : f32 from vector<1x1x1xf32>
    %c0_21 = arith.constant 0 : index
    %c0_22 = arith.constant 0 : index
    %66 = vector.load %arg3[%c0_21, %c0_22] : memref<1x32xf32, #tpu.memory_space<vmem>>, vector<1x32xf32>
    %c0_23 = arith.constant 0 : index
    %c0_24 = arith.constant 0 : index
    %67 = vector.load %arg4[%c0_23, %c0_24] : memref<1x32xf32, #tpu.memory_space<vmem>>, vector<1x32xf32>
    %cst_25 = arith.constant 9.99999997E-7 : f32
    %68 = vector.broadcast %cst_25 : f32 to vector<1x32xf32>
    %69 = arith.subf %68, %66 : vector<1x32xf32>
    %70 = math.absf %69 : vector<1x32xf32>
    %cst_26 = arith.constant 9.99999997E-7 : f32
    %71 = vector.broadcast %cst_26 : f32 to vector<1x32xf32>
    %72 = arith.subf %71, %67 : vector<1x32xf32>
    %73 = math.absf %72 : vector<1x32xf32>
    %74 = arith.subf %70, %73 : vector<1x32xf32>
    %cst_27 = arith.constant 1.500000e+01 : f32
    %75 = vector.broadcast %cst_27 : f32 to vector<1x32xf32>
    %76 = arith.addf %74, %75 : vector<1x32xf32>
    %cst_28 = arith.constant 0.000000e+00 : f32
    %77 = vector.broadcast %cst_28 : f32 to vector<1x32xf32>
    %78 = arith.maximumf %76, %77 : vector<1x32xf32>
    %cst_29 = arith.constant 3.125000e-02 : f32
    %79 = vector.broadcast %cst_29 : f32 to vector<1x32xf32>
    %80 = arith.mulf %78, %79 : vector<1x32xf32>
    %81 = vector.shape_cast %80 : vector<1x32xf32> to vector<1x1x32xf32>
    %cst_30 = arith.constant dense<0.000000e+00> : vector<1xf32>
    %82 = vector.multi_reduction <add>, %81, %cst_30 [1, 2] : vector<1x1x32xf32> to vector<1xf32>
    %83 = vector.shape_cast %82 : vector<1xf32> to vector<1x1x1xf32>
    %84 = vector.extract %83[0, 0, 0] : f32 from vector<1x1x1xf32>
    %85 = arith.addf %65, %84 : f32
    %c0_31 = arith.constant 0 : index
    %86 = memref.load %arg5[%c0_31] : memref<3xf32, #tpu.memory_space<smem>>
    memref.store %85, %arg5[%c0_31] : memref<3xf32, #tpu.memory_space<smem>>
    %c1_32 = arith.constant 1 : index
    %87 = memref.load %arg5[%c1_32] : memref<3xf32, #tpu.memory_space<smem>>
    memref.store %65, %arg5[%c1_32] : memref<3xf32, #tpu.memory_space<smem>>
    %c2_33 = arith.constant 2 : index
    %88 = memref.load %arg5[%c2_33] : memref<3xf32, #tpu.memory_space<smem>>
    memref.store %84, %arg5[%c2_33] : memref<3xf32, #tpu.memory_space<smem>>
    return
  }
}

</mosaic_0001>

<bundles_post_ra>
// kernel: tpu_custom_call.1
= control target key start
LH: loop header
LB: loop body
LE: loop exit
PB: predicated region body
PF: predicated region fallthrough
CT: control target
= control target key end

     0   :  { %10 = vsyncpa [#allocation4], 0  ;;  %s263_s0 = inlined_call_operand.hbm [shape: f32[4], index: 0, kind: input, shape index: {}]   ;;  %s264_s1 = inlined_call_operand.hbm [shape: f32[2,16], index: 1, kind: input, shape index: {}]   ;;  %s265_s2 = inlined_call_operand.vmem [shape: f32[2,16], index: 2, kind: input, shape index: {}]   ;;  %s266_s3 = inlined_call_operand.vmem [shape: f32[1,32], index: 3, kind: input, shape index: {}]   ;;  %s267_s4 = inlined_call_operand.vmem [shape: f32[1,32], index: 4, kind: input, shape index: {}]   ;;  %s268_s5 = inlined_call_operand.hbm [shape: f32[3], index: 5, kind: output, shape index: {}]  }
   0x1   :  { %11 = vsyncpa [#allocation3], 0 }
   0x2   :  { %12 = vsyncpa [#allocation5], 0  ;;  %s212_s18 = smov [#allocation2]   ;;  %s213_s21 = smov [#allocation6]  }
   0x3   :  { %20 = dma.hbm_to_smem %s263_s0, 16, %s212_s18, [#allocation4]  }
   0x4   :  { %s27_s22 = sshll.u32 %s213_s21, 4  ;;  %s28_s22 = int_to_ptr.vmem [resolvable:$true] %s27_s22 }
   0x5   :  { %s186_s23 = scalar_lea.vmem %s28_s22, 32  ;;  %p191_p1 = scmp.lt.s32.totalorder %s28_s22, %s28_s22 }
   0x6   :  { %p187_p0 = scmp.ne.s32.totalorder %s28_s22, %s186_s23  ;;  %p192_p2 = scmp.lt.s32.totalorder %s186_s23, %s186_s23 }
   0x8   :  { %p193_p3 = por %p192_p2, %p191_p1 }
   0xa   :  { %p194_p4 = pnand %p193_p3, %p187_p0 }
   0xc   :  { %197 = shalt.err (!%p194_p4)
}
   0xd   :  { %30 = dma.hbm_to_vmem [thread:$0]  %s264_s1, 32, %s28_s22, [#allocation3]  }
   0xe   :  { %206 = dma.done.wait [#allocation4], 16  }
   0xf   :  { %207 = vsyncadd [#allocation4], 4294967280 }
  0x10   :  { %208 = dma.done.wait [#allocation3], 32  }
  0x11   :  { %209 = vsyncadd [#allocation3], 4294967264 }
  0x12   :  { %43 = sfence }
  0x13   :  { %v60_v0 = vld [vmem:[#allocation6] sm:$0x3]  ;;  %vm62_vm0 = vcmask 123904   ;;  %v44_v6 = vlaneseq  ;;  %s47_s27 = sld [smem:[#allocation2]]  ;;  %vm98_vm3 = vcmask 1024   ;;  %vm119_vm4 = vcmask 253952  }
  0x14   :  { %v61_v1 = vld [vmem:[%s265_s2] sm:$0x3]  ;;  %v63_v2 = vsel %vm62_vm0, %v60_v0, 0.0  ;;  %s153_s1 = sld [smem:[#allocation2 + $0x1]]  ;;  %s214_s9 = smov [#allocation7]  }
  0x15   :  { %64 = vadd.xlane.f32.xlu0 %v63_v2  ;;  %v68_v3 = vsel %vm62_vm0, %v61_v1, 0.0  ;;  %v45_v10 = vshrl.u32 %v44_v6, 7  ;;  %s152_s28 = sld [smem:[#allocation2 + $0x2]]  ;;  %v109_v15 = vld [vmem:[%s266_s3] sm:$0x1] }
  0x16   :  { %s154_s29 = sld [smem:[#allocation2 + $0x3]]  ;;  %v110_v16 = vld [vmem:[%s267_s4] sm:$0x1]  ;;  %v111_v19 = vsub.f32 1e-06, %v109_v15 }
  0x17   :  { %vm46_vm1 = vcmp.eq.s32.totalorder %v45_v10, 0  ;;  %vm53_vm2 = vcmp.eq.s32.totalorder %v45_v10, 1  ;;  %v113_v20 = vsub.f32 1e-06, %v110_v16 }
  0x18   :  { %v112_v29 = vand.u32 2147483647, %v111_v19 }
  0x19   :  { %69 = vadd.xlane.f32.xlu0 %v68_v3  ;;  %v48_v12 = vstv %s47_s27  ;;  %v114_v30 = vand.u32 2147483647, %v113_v20 }
  0x1a   :  { %v49_v13 = vsel %vm46_vm1, %v48_v12, 0.0  ;;  %v55_v14 = vstv %s153_s1 }
  0x1b   :  { %v51_v17 = vstv %s152_s28  ;;  %v56_v18 = vsel %vm53_vm2, %v55_v14, %v49_v13  ;;  %v115_v40 = vsub.f32 %v112_v29, %v114_v30 }
  0x1c   :  { %v52_v22 = vsel %vm46_vm1, %v51_v17, 0.0  ;;  %v58_v23 = vstv %s154_s29  ;;  %v76_v26 = vsub.f32 1.0, %v56_v18 }
  0x1d   :  { %v59_v28 = vsel %vm53_vm2, %v58_v23, %v52_v22  ;;  %v116_v46 = vadd.f32 15.0, %v115_v40 }
  0x1e   :  { %v88_v36 = vsub.f32 1.0, %v59_v28 }
  0x1f   :  { %v117_v50 = vmax.f32 %v116_v46, 0.0 }
  0x21   :  { %v118_v53 = vmul.f32 0.03125, %v117_v50 }
  0x23   :  { %v120_v55 = vsel %vm119_vm4, %v118_v53, 0.0 }
  0x9e   :  { %v65_v4 = vpop.xlane.xlu0 %64 }
  0x9f   :  { %v67_v5 = vmul.f32 0.0625, %v65_v4 }
  0xa1   :  { %162 = vlog2.f32 %v67_v5  ;;  %v77_v7 = vsub.f32 1.0, %v67_v5 }
  0xa2   :  { %v70_v8 = vpop.xlane.xlu0 %69 }
  0xa3   :  { %164 = vlog2.f32 %v77_v7  ;;  %v71_v9 = vmul.f32 0.0625, %v70_v8 }
  0xa5   :  { %166 = vlog2.f32 %v71_v9  ;;  %v89_v11 = vsub.f32 1.0, %v71_v9 }
  0xa7   :  { %168 = vlog2.f32 %v89_v11 }
  0xae   :  { %v163_v21 = vpop.eup %162 }
  0xaf   :  { %v73_v24 = vmul.f32 0.6931472, %v163_v21 }
  0xb0   :  { %v165_v25 = vpop.eup %164 }
  0xb1   :  { %v79_v27 = vmul.f32 0.6931472, %v165_v25  ;;  %v74_v32 = vmax.f32 %v73_v24, -100.0 }
  0xb2   :  { %v167_v31 = vpop.eup %166 }
  0xb3   :  { %v80_v33 = vmax.f32 %v79_v27, -100.0  ;;  %v85_v34 = vmul.f32 0.6931472, %v167_v31  ;;  %v75_v42 = vmul.f32 %v74_v32, %v56_v18 }
  0xb4   :  { %v169_v35 = vpop.eup %168 }
  0xb5   :  { %v86_v37 = vmax.f32 %v85_v34, -100.0  ;;  %v91_v38 = vmul.f32 0.6931472, %v169_v35  ;;  %v81_v39 = vmul.f32 %v80_v33, %v76_v26 }
  0xb7   :  { %v92_v41 = vmax.f32 %v91_v38, -100.0  ;;  %v82_v43 = vadd.f32 %v81_v39, %v75_v42  ;;  %v87_v44 = vmul.f32 %v86_v37, %v59_v28 }
  0xb9   :  { %v93_v45 = vmul.f32 %v92_v41, %v88_v36  ;;  %v83_v48 = vsub.f32 0.0, %v82_v43 }
  0xbb   :  { %v94_v47 = vadd.f32 %v93_v45, %v87_v44 }
  0xbd   :  { %v95_v49 = vsub.f32 0.0, %v94_v47 }
  0xbf   :  { %v96_v51 = vadd.f32 %v95_v49, %v83_v48 }
  0xc1   :  { %v97_v52 = vmul.f32 0.25, %v96_v51 }
  0xc3   :  { %v99_v54 = vsel %vm98_vm3, %v97_v52, 0.0 }
  0xc4   :  { %100 = vadd.xlane.f32.xlu1 %v99_v54 }
  0xc8   :  { %121 = vadd.xlane.f32.xlu1 %v120_v55 }
 0x14d   :  { %v101_v56 = vpop.xlane.xlu1 %100 }
 0x14e   :  { %v102_v57 = vrot.slane %v101_v56, 4 }
 0x150   :  { %v103_v58 = vadd.f32 %v102_v57, %v101_v56 }
 0x151   :  { %v122_v59 = vpop.xlane.xlu1 %121 }
 0x152   :  { %v104_v60 = vrot.slane %v103_v58, 2  ;;  %v123_v61 = vrot.slane %v122_v59, 4 }
 0x154   :  { %v124_v62 = vadd.f32 %v123_v61, %v122_v59  ;;  %v105_v63 = vadd.f32 %v104_v60, %v103_v58 }
 0x156   :  { %v125_v0 = vrot.slane %v124_v62, 2  ;;  %v106_v1 = vrot.slane %v105_v63, 1 }
 0x158   :  { %v126_v2 = vadd.f32 %v125_v0, %v124_v62  ;;  %v107_v3 = vadd.f32 %v106_v1, %v105_v63 }
 0x15a   :  { %155 = vpush %v107_v3  ;;  %v127_v4 = vrot.slane %v126_v2, 1 }
 0x15c   :  { %v128_v5 = vadd.f32 %v127_v4, %v126_v2 }
 0x15e   :  { %157 = vpush %v128_v5 }
 0x18b   :  { %s156_s3 = spop %155 }
 0x18c   :  { %134 = sst [smem:[#allocation7 + $0x1]] %s156_s3 }
 0x18f   :  { %s158_s4 = spop %157 }
 0x190   :  { %s130_s8 = sadd.f32 %s158_s4, %s156_s3 }
 0x191   :  { %136 = sst [smem:[#allocation7 + $0x2]] %s158_s4 }
 0x192   :  { %132 = sst [smem:[#allocation7]] %s130_s8 }
 0x193   :  { %144 = dma.smem_to_hbm %s214_s9, 16, %s268_s5, [#allocation5]  }
 0x194   :  { %210 = dma.done.wait [#allocation5], 16  }
 0x195   :  { %211 = vsyncadd [#allocation5], 4294967280 }
 0x196   :  { %148 = sfence }
 0x197   :  { %149 = vsyncpa [#allocation3], 1 }
 0x198   :  { %150 = vsyncpa [#allocation4], 1 }
 0x199   :  { %151 = vsyncpa [#allocation5], 1 }

</bundles_post_ra>
